<compile_context>
chip_gen: v6e
topology: v6e:2x2x1
jax: 0.10.0
libtpu: 0.0.40
codegen_flags: <defaults>
</compile_context>

<pallas_src>
import math

import jax
import jax.numpy as jnp
from jax.experimental import pallas as pl
from jax.experimental.pallas import tpu as pltpu


def _round_up(n, m):
    return ((n + m - 1) // m) * m


def _ceil_div(a, b):
    return (a + b - 1) // b


_GELU_C = math.sqrt(2.0 / math.pi)
_GELU_A = 0.044715 * _GELU_C


def _gelu_tanh(x):
    # GELU, tanh approximation (matches nn.GELU(approximate='tanh')), with a
    # trimmed VPU op count: t = x*(c + (0.044715*c)*x^2); y = x*(0.5 + 0.5*tanh(t)).
    u = x * x
    t = x * (_GELU_C + _GELU_A * u)
    return x * (0.5 + 0.5 * jnp.tanh(t))


def mlp_kernel(x_ref, w1_ref, b1_ref, w2_ref, b2_ref, o_ref, acc_ref):
    # Grid: (ceil(M/tm), H // th). Axis 0 is parallel over row tiles, axis 1 is
    # a reduction over chunks of the 4C hidden dimension.
    #   x_ref:  (tm, C)   row tile (resident across the H axis), compute dtype
    #   w1_ref: (C, th)   fc weight chunk
    #   b1_ref: (1, th)   fc bias chunk (f32)
    #   w2_ref: (th, C)   proj weight chunk
    #   b2_ref: (1, C)    proj bias (f32, constant)
    #   o_ref:  (tm, C)   output tile (written on last H step)
    #   acc_ref:(tm, C)   f32 accumulator scratch
    h_idx = pl.program_id(1)

    @pl.when(h_idx == 0)
    def _init():
        # Fold the proj bias into the accumulator once per row tile.
        acc_ref[...] = jnp.broadcast_to(
            b2_ref[...].astype(jnp.float32), acc_ref.shape)

    # MXU consumes the native dtype (bf16 by default) with f32 accumulation.
    h = jnp.dot(x_ref[...], w1_ref[...], preferred_element_type=jnp.float32)
    h = _gelu_tanh(h + b1_ref[...])                       # bias + GELU in f32
    acc_ref[...] += jnp.dot(h.astype(w2_ref.dtype), w2_ref[...],
                            preferred_element_type=jnp.float32)

    @pl.when(h_idx == pl.num_programs(1) - 1)
    def _store():
        o_ref[...] = acc_ref[...].astype(o_ref.dtype)


# Conservative VMEM budgets (v7x: 64 MiB physical, 32 MiB scoped default;
# v5e/v6e: 128 MiB physical). Tiles are sized against _VMEM_TILE_BUDGET and the
# scoped limit is raised to _VMEM_LIMIT_BYTES, which is safe on all generations.
_VMEM_TILE_BUDGET = 40 * 1024 * 1024
_VMEM_LIMIT_BYTES = 48 * 1024 * 1024


def _tile_vmem_bytes(tm, th, C, itemsize):
    weights = 2 * (C * th + th * C) * itemsize   # w1+w2 chunks, double-buffered
    x_blk = 2 * tm * C * itemsize                # x block, double-buffered
    out_blk = 2 * tm * C * itemsize              # out block, double-buffered
    acc = tm * C * 4                             # f32 accumulator scratch
    hidden = tm * th * 4                         # f32 GELU intermediate
    bias = 2 * (th + C) * 4
    return weights + x_blk + out_blk + acc + hidden + bias


def _pick_th(C, H, tm, itemsize, th_request):
    # Candidates: full H first (weights are then DMA'd from HBM exactly once,
    # since their block index is constant over the whole grid), then
    # lane-aligned divisors of H, largest first.
    cands = [H] + [t for t in range(H - 128, 127, -128) if H % t == 0]
    if th_request is not None:
        cands = [t for t in cands if t <= th_request] or cands[-1:]
    for t in cands:
        if _tile_vmem_bytes(tm, t, C, itemsize) <= _VMEM_TILE_BUDGET:
            return t
    return cands[-1]


def mlp_forward(x, w1, b1, w2, b2, *, tm=512, th=None,
                compute_dtype=jnp.bfloat16):
    """GPT-2 MLP: y = GELU_tanh(x @ w1 + b1) @ w2 + b2.

    x: (B, T, C) -> (B, T, C). Weights: w1 (C, 4C), b1 (4C,), w2 (4C, C), b2 (C,).
    The matmuls are fed to the MXU in `compute_dtype` (bf16 by default);
    accumulation, biases and GELU stay in f32. Output dtype = x.dtype.
    tm: row tile (big values drive weight reuse; clamped / split automatically).
    th: optional cap on the hidden-dim tile (auto-sized against VMEM otherwise).
    """
    B, T, C = x.shape
    H = w1.shape[1]
    assert w1.shape == (C, H) and w2.shape == (H, C)
    assert b1.shape == (H,) and b2.shape == (C,)

    out_dtype = x.dtype
    M = B * T
    x2d = x.reshape(M, C).astype(compute_dtype)
    w1c = w1.astype(compute_dtype)
    w2c = w2.astype(compute_dtype)
    b1_2d = b1.reshape(1, H).astype(jnp.float32)
    b2_2d = b2.reshape(1, C).astype(jnp.float32)
    itemsize = jnp.dtype(compute_dtype).itemsize

    # Row tile: multiple of 8, clamped to the 8-rounded row count. No jnp.pad
    # round-trip: the grid uses a partial last block (rows never mix across the
    # row dimension; out-of-bounds output rows are masked on store).
    tm = max(8, _round_up(tm, 8))
    m_ceil = _round_up(M, 8)
    tm = min(tm, m_ceil)
    # v7x megacore: keep >= 2 row tiles so both TensorCores get work.
    if m_ceil >= 256 and _ceil_div(M, tm) < 2:
        tm = _round_up(_ceil_div(m_ceil, 2), 8)

    th = _pick_th(C, H, tm, itemsize, th)
    assert th == H or th % 128 == 0

    grid = (_ceil_div(M, tm), H // th)

    out2d = pl.pallas_call(
        mlp_kernel,
        out_shape=jax.ShapeDtypeStruct((M, C), out_dtype),
        grid_spec=pltpu.PrefetchScalarGridSpec(
            num_scalar_prefetch=0,
            grid=grid,
            in_specs=[
                pl.BlockSpec((tm, C), lambda i, h: (i, 0)),   # x rows (resident over h)
                pl.BlockSpec((C, th), lambda i, h: (0, h)),   # w1 chunk
                pl.BlockSpec((1, th), lambda i, h: (0, h)),   # b1 chunk
                pl.BlockSpec((th, C), lambda i, h: (h, 0)),   # w2 chunk
                pl.BlockSpec((1, C), lambda i, h: (0, 0)),    # b2 (constant)
            ],
            out_specs=pl.BlockSpec((tm, C), lambda i, h: (i, 0)),
            scratch_shapes=[pltpu.VMEM((tm, C), jnp.float32)],
        ),
        compiler_params=pltpu.CompilerParams(
            dimension_semantics=("parallel", "arbitrary"),
            vmem_limit_bytes=_VMEM_LIMIT_BYTES),
    )(x2d, w1c, b1_2d, w2c, b2_2d)

    return out2d.reshape(B, T, C)


def reference_mlp(x, w1, b1, w2, b2):
    h = jnp.einsum("btc,ch->bth", x, w1) + b1
    h = _gelu_tanh(h)
    return jnp.einsum("bth,hc->btc", h, w2) + b2


if __name__ == "__main__":
    # Small GPT-2-style config (lane-aligned): n_embd=128 -> hidden=512.
    C = 128
    H = 4 * C

    key = jax.random.PRNGKey(0)
    kx, k1, k2, k3, k4, kx2 = jax.random.split(key, 6)

    # Deterministic parameter init (shapes follow nn.Linear in the module).
    w1 = jax.random.normal(k1, (C, H), dtype=jnp.float32) * 0.02
    b1 = jax.random.normal(k2, (H,), dtype=jnp.float32) * 0.02
    w2 = jax.random.normal(k3, (H, C), dtype=jnp.float32) * 0.02
    b2 = jax.random.normal(k4, (C,), dtype=jnp.float32) * 0.02

    B, T = 2, 8
    x = jax.random.normal(kx, (B, T, C), dtype=jnp.float32)
    ref = reference_mlp(x, w1, b1, w2, b2)

    # Test 1: f32 compute path, th=256 — exercises the multi-step H reduction.
    out = mlp_forward(x, w1, b1, w2, b2, th=256, compute_dtype=jnp.float32)
    out = jax.block_until_ready(out)
    assert out.shape == (B, T, C)
    assert jnp.allclose(out, ref, atol=1e-4, rtol=1e-4), "mismatch (test 1, f32)"

    # Test 2: default bf16 MXU feed, auto th (-> th=H, weights VMEM-resident).
    out_bf = mlp_forward(x, w1, b1, w2, b2)
    out_bf = jax.block_until_ready(out_bf)
    assert out_bf.shape == (B, T, C)
    assert jnp.allclose(out_bf, ref, atol=2e-2, rtol=2e-2), "mismatch (test 2, bf16)"

    # Test 3: ragged B*T (3*5=15 rows), tm=8 — exercises the partial last row
    # tile (no jnp.pad) and a multi-tile parallel M axis, bf16 compute.
    B2, T2 = 3, 5
    x2 = jax.random.normal(kx2, (B2, T2, C), dtype=jnp.float32)
    out2 = mlp_forward(x2, w1, b1, w2, b2, tm=8, th=256)
    out2 = jax.block_until_ready(out2)
    ref2 = reference_mlp(x2, w1, b1, w2, b2)
    assert out2.shape == (B2, T2, C)
    assert jnp.allclose(out2, ref2, atol=2e-2, rtol=2e-2), "mismatch (test 3, ragged)"

    print("KERNEL_OK")
</pallas_src>

<mosaic_0001>
module attributes {stable_mosaic.version = 11 : i64} {
  func.func @mlp_kernel(%arg0: i32, %arg1: i32, %arg2: memref<16x128xf32, #tpu.memory_space<vmem>>, %arg3: memref<128x256xf32, #tpu.memory_space<vmem>>, %arg4: memref<1x256xf32, #tpu.memory_space<vmem>>, %arg5: memref<256x128xf32, #tpu.memory_space<vmem>>, %arg6: memref<1x128xf32, #tpu.memory_space<vmem>>, %arg7: memref<16x128xf32, #tpu.memory_space<vmem>>, %arg8: memref<16x128xf32, #tpu.memory_space<vmem>>) attributes {dimension_semantics = [#tpu.dimension_semantics<parallel>, #tpu.dimension_semantics<arbitrary>], iteration_bounds = array<i64: 1, 2>, scalar_prefetch = 0 : i64, scratch_operands = 1 : i64, tpu.core_type = #tpu.core_type<tc>, window_params = [{transform_indices = @transform_0, window_bounds = array<i64: 16, 128>}, {transform_indices = @transform_1, window_bounds = array<i64: 128, 256>}, {transform_indices = @transform_2, window_bounds = array<i64: 1, 256>}, {transform_indices = @transform_3, window_bounds = array<i64: 256, 128>}, {pipeline_mode = #tpu.pipeline_mode<synchronous>, transform_indices = @transform_4, window_bounds = array<i64: 1, 128>}, {transform_indices = @transform_5, window_bounds = array<i64: 16, 128>}]} {
    %c0_i32 = arith.constant 0 : i32
    %0 = arith.cmpi eq, %arg1, %c0_i32 : i32
    %1 = arith.extui %0 : i1 to i32
    %c0_i32_0 = arith.constant 0 : i32
    %2 = arith.cmpi ne, %1, %c0_i32_0 : i32
    scf.if %2 {
      %c0_18 = arith.constant 0 : index
      %c0_19 = arith.constant 0 : index
      %29 = vector.load %arg6[%c0_18, %c0_19] : memref<1x128xf32, #tpu.memory_space<vmem>>, vector<1x128xf32>
      %30 = vector.shape_cast %29 : vector<1x128xf32> to vector<1x128xf32>
      %31 = vector.broadcast %30 : vector<1x128xf32> to vector<16x128xf32>
      %c0_20 = arith.constant 0 : index
      %c0_21 = arith.constant 0 : index
      %32 = vector.load %arg8[%c0_20, %c0_21] : memref<16x128xf32, #tpu.memory_space<vmem>>, vector<16x128xf32>
      tpu.vector_store %arg8[%c0_20, %c0_21], %31 {strides = array<i32>} : memref<16x128xf32, #tpu.memory_space<vmem>>, vector<16x128xf32>,
    } else {
    }
    %c0 = arith.constant 0 : index
    %c0_1 = arith.constant 0 : index
    %3 = vector.load %arg2[%c0, %c0_1] : memref<16x128xf32, #tpu.memory_space<vmem>>, vector<16x128xf32>
    %c0_2 = arith.constant 0 : index
    %c0_3 = arith.constant 0 : index
    %4 = vector.load %arg3[%c0_2, %c0_3] : memref<128x256xf32, #tpu.memory_space<vmem>>, vector<128x256xf32>
    %cst = arith.constant dense<0.000000e+00> : vector<16x256xf32>
    %5 = tpu.matmul %3, %4, %cst {dimension_numbers = #tpu.dot_dimension_numbers<[1], [0], [0], [1], [0, 0, 1, 1], [], []>} : vector<16x128xf32>, vector<128x256xf32>, vector<16x256xf32> -> vector<16x256xf32>
    %c0_4 = arith.constant 0 : index
    %c0_5 = arith.constant 0 : index
    %6 = vector.load %arg4[%c0_4, %c0_5] : memref<1x256xf32, #tpu.memory_space<vmem>>, vector<1x256xf32>
    %7 = vector.broadcast %6 : vector<1x256xf32> to vector<16x256xf32>
    %8 = arith.addf %5, %7 : vector<16x256xf32>
    %9 = arith.mulf %8, %8 : vector<16x256xf32>
    %cst_6 = arith.constant 0.0356774069 : f32
    %10 = vector.broadcast %cst_6 : f32 to vector<16x256xf32>
    %11 = arith.mulf %10, %9 : vector<16x256xf32>
    %cst_7 = arith.constant 0.797884583 : f32
    %12 = vector.broadcast %cst_7 : f32 to vector<16x256xf32>
    %13 = arith.addf %12, %11 : vector<16x256xf32>
    %14 = arith.mulf %8, %13 : vector<16x256xf32>
    %15 = math.tanh %14 : vector<16x256xf32>
    %cst_8 = arith.constant 5.000000e-01 : f32
    %16 = vector.broadcast %cst_8 : f32 to vector<16x256xf32>
    %17 = arith.mulf %16, %15 : vector<16x256xf32>
    %cst_9 = arith.constant 5.000000e-01 : f32
    %18 = vector.broadcast %cst_9 : f32 to vector<16x256xf32>
    %19 = arith.addf %18, %17 : vector<16x256xf32>
    %20 = arith.mulf %8, %19 : vector<16x256xf32>
    %c0_10 = arith.constant 0 : index
    %c0_11 = arith.constant 0 : index
    %21 = vector.load %arg8[%c0_10, %c0_11] : memref<16x128xf32, #tpu.memory_space<vmem>>, vector<16x128xf32>
    %c0_12 = arith.constant 0 : index
    %c0_13 = arith.constant 0 : index
    %22 = vector.load %arg5[%c0_12, %c0_13] : memref<256x128xf32, #tpu.memory_space<vmem>>, vector<256x128xf32>
    %cst_14 = arith.constant dense<0.000000e+00> : vector<16x128xf32>
    %23 = tpu.matmul %20, %22, %cst_14 {dimension_numbers = #tpu.dot_dimension_numbers<[1], [0], [0], [1], [0, 0, 1, 1], [], []>} : vector<16x256xf32>, vector<256x128xf32>, vector<16x128xf32> -> vector<16x128xf32>
    %24 = arith.addf %21, %23 : vector<16x128xf32>
    %c0_15 = arith.constant 0 : index
    %c0_16 = arith.constant 0 : index
    %25 = vector.load %arg8[%c0_15, %c0_16] : memref<16x128xf32, #tpu.memory_space<vmem>>, vector<16x128xf32>
    tpu.vector_store %arg8[%c0_15, %c0_16], %24 {strides = array<i32>} : memref<16x128xf32, #tpu.memory_space<vmem>>, vector<16x128xf32>,
    %c1_i32 = arith.constant 1 : i32
    %26 = arith.cmpi eq, %arg1, %c1_i32 : i32
    %27 = arith.extui %26 : i1 to i32
    %c0_i32_17 = arith.constant 0 : i32
    %28 = arith.cmpi ne, %27, %c0_i32_17 : i32
    scf.if %28 {
      %c0_18 = arith.constant 0 : index
      %c0_19 = arith.constant 0 : index
      %29 = vector.load %arg8[%c0_18, %c0_19] : memref<16x128xf32, #tpu.memory_space<vmem>>, vector<16x128xf32>
      %c0_20 = arith.constant 0 : index
      %c0_21 = arith.constant 0 : index
      %30 = vector.load %arg7[%c0_20, %c0_21] : memref<16x128xf32, #tpu.memory_space<vmem>>, vector<16x128xf32>
      tpu.vector_store %arg7[%c0_20, %c0_21], %29 {strides = array<i32>} : memref<16x128xf32, #tpu.memory_space<vmem>>, vector<16x128xf32>,
    } else {
    }
    return
  }
  func.func @transform_0(%arg0: i32, %arg1: i32) -> (i32, i32) {
    %c0_i32 = arith.constant 0 : i32
    %c0_i32_0 = arith.constant 0 : i32
    return %arg0, %c0_i32 : i32, i32
  }
  func.func @transform_1(%arg0: i32, %arg1: i32) -> (i32, i32) {
    %c0_i32 = arith.constant 0 : i32
    %c0_i32_0 = arith.constant 0 : i32
    return %c0_i32, %arg1 : i32, i32
  }
  func.func @transform_2(%arg0: i32, %arg1: i32) -> (i32, i32) {
    %c0_i32 = arith.constant 0 : i32
    %c0_i32_0 = arith.constant 0 : i32
    return %c0_i32, %arg1 : i32, i32
  }
  func.func @transform_3(%arg0: i32, %arg1: i32) -> (i32, i32) {
    %c0_i32 = arith.constant 0 : i32
    %c0_i32_0 = arith.constant 0 : i32
    return %arg1, %c0_i32 : i32, i32
  }
  func.func @transform_4(%arg0: i32, %arg1: i32) -> (i32, i32) {
    %c0_i32 = arith.constant 0 : i32
    %c0_i32_0 = arith.constant 0 : i32
    %c0_i32_1 = arith.constant 0 : i32
    return %c0_i32, %c0_i32_0 : i32, i32
  }
  func.func @transform_5(%arg0: i32, %arg1: i32) -> (i32, i32) {
    %c0_i32 = arith.constant 0 : i32
    %c0_i32_0 = arith.constant 0 : i32
    return %arg0, %c0_i32 : i32, i32
  }
}

</mosaic_0001>

<bundles_post_ra>
// kernel: tpu_custom_call.1
= control target key start
LH: loop header
LB: loop body
LE: loop exit
PB: predicated region body
PF: predicated region fallthrough
CT: control target
= control target key end

     0   :  { %s1431_s0 = inlined_call_operand.hbm [shape: f32[16,128], index: 0, kind: input, shape index: {}]   ;;  %s1432_s1 = inlined_call_operand.hbm [shape: f32[128,512], index: 1, kind: input, shape index: {}]   ;;  %s1433_s2 = inlined_call_operand.hbm [shape: f32[1,512], index: 2, kind: input, shape index: {}]   ;;  %s1434_s3 = inlined_call_operand.hbm [shape: f32[512,128], index: 3, kind: input, shape index: {}]   ;;  %s1435_s4 = inlined_call_operand.vmem [shape: f32[1,128], index: 4, kind: input, shape index: {}]   ;;  %s1436_s5 = inlined_call_operand.hbm [shape: f32[16,128], index: 5, kind: output, shape index: {}]  }
   0x1   :  { %1440 = sst [smem:[#allocation16_spill]] %s1431_s0 }
   0x2   :  { %10 = vsyncpa [#allocation4], 0 }
   0x3   :  { %11 = vsyncpa [#allocation7], 0 }
   0x4   :  { %13 = vsyncpa [#allocation7 + $0x1], 0 }
   0x5   :  { %14 = vsyncpa [#allocation10], 0 }
   0x6   :  { %16 = vsyncpa [#allocation10 + $0x1], 0 }
   0x7   :  { %17 = vsyncpa [#allocation5], 0  ;;  %s1176_s18 = smov 0   ;;  %s1178_s19 = smov 0  }
   0x8   :  { %s1180_s20 = smov 0   ;;  %s1182_s21 = smov 0  }
   0x9   :  { %s1184_s22 = smov 0   ;;  %s1186_s23 = smov 0  }
   0xa LB: > { %s32_s24 = sadd.s32 1, %s1127_s22  ;;  %s68_s25 = sadd.s32 1, %s1119_s20  ;;  %s1131_s23 = sphi %s1186_s23, %s23_s23   ;;  %s1127_s22 = sphi %s1184_s22, %s1453_s22   ;;  %s1123_s21 = sphi %s1182_s21, %s1452_s21   ;;  %s1119_s20 = sphi %s1180_s20, %s1451_s20   ;;  %s1115_s19 = sphi %s1178_s19, %s1450_s19   ;;  %s1111_s18 = sphi %s1176_s18, %s1449_s18  }
   0xb   : > { %p33_p0 = scmp.ge.s32.totalorder %s32_s24, 2  ;;  %p75_p1 = scmp.ne.s32.totalorder %s1119_s20, %s1115_s19 }
   0xc   : > { %p76_p2 = scmp.eq.s32.totalorder %s1131_s23, 0  ;;  %p865_p4 = scmp.lt.s32.totalorder %s1131_s23, 2 }
   0xd   : > { %s1455_s24 = smov (%p33_p0, %s32_s24), 0  ;;  %s223_s27 = sand.u32 1, %s1131_s23  }
   0xe   : > { %p77_p3 = por %p76_p2, %p75_p1  ;;  %s65_s26 = ssub.s32 %s1127_s22, %s1455_s24 }
   0xf   : > { %p66_p5 = scmp.eq.s32.totalorder %s65_s26, 0  ;;  %s1218_s28 = sand.u32 1, %s1119_s20  }
  0x10   : > { %s795_s29 = sshll.u32 %s1127_s22, 8  ;;  %s1437_s6 = sshll.u32 %s1218_s28, 8 }
  0x11   : > { %s1222_s30 = scalar_select %p66_p5, %s1119_s20, %s68_s25  }
  0x12   : > { %s233_s9 = scalar_lea.hbm %s1432_s1, %s795_s29  ;;  %p1228_p6 = pnand %p865_p4, %p77_p3 }
  0x13   : > { %s227_s11 = scalar_lea.vmem [#allocation6], %s1437_s6  ;;  %s1234_s13 = scalar_lea.sflag [#allocation7], %s223_s27 }
  0x14   : > { %s234_s12 = sshll.u32 %s227_s11, 4  ;;  %p937_p7 = pneg %p1228_p6  ;;  %s235_s12 = int_to_ptr.vmem [resolvable:$true] %s234_s12 }
  0x15   : > { %s948_s14 = scalar_lea.vmem %s235_s12, 4096  ;;  %s1133_s15 = smov [#allocation6]  }
  0x16   : > { %p949_p8 = scmp.ne.s32.totalorder %s235_s12, %s948_s14  ;;  %s953_s16 = sshll.u32 %s1133_s15, 4  ;;  %s954_s16 = int_to_ptr.vmem [resolvable:$false] %s953_s16 }
  0x17   : > { %s955_s17 = scalar_lea.vmem %s954_s16, 8192  ;;  %p956_p11 = scmp.lt.s32.totalorder %s235_s12, %s954_s16 }
  0x18   : > { %p951_p9 = pnand %p949_p8, %p937_p7  ;;  %p957_p12 = scmp.lt.s32.totalorder %s955_s17, %s948_s14 }
  0x1a   : > { %p952_p10 = pneg %p951_p9  ;;  %p958_p13 = por %p957_p12, %p956_p11 }
  0x1c   : > { %p959_p0 = pnand %p958_p13, %p952_p10 }
  0x1e   : > { %962 = shalt.err (!%p959_p0)
}
  0x1f   : > { %s1134_s25 = smov 512   ;;  %s1135_s26 = smov 256  }
  0x20   : > { %s1136_s27 = smov 16   ;;  %s1245_s29 = sadd.s32 4294967295, %s1131_s23  }
  0x21   : > { %857 = dma.hbm_to_vmem [thread:$0]  (!%p1228_p6), %s233_s9, 4096, %s235_s12, %s1234_s13, %s1134_s25, %s1135_s26, %s1136_s27  }
  0x22   : > { %p81_p1 = scmp.ne.s32.totalorder %s1115_s19, %s1111_s18  ;;  %p82_p2 = scmp.eq.s32.totalorder %s1245_s29, 0 }
  0x23   : > { %p771_p3 = scmp.ge.s32.totalorder %s1131_s23, 1  ;;  %p191_p4 = scmp.lt.s32.totalorder %s1131_s23, 3 }
  0x24   : > { %p1254_p5 = por %p82_p2, %p81_p1  ;;  %s1137_s9 = smov [#allocation3]  }
  0x25   : > { %p1258_p8 = pnand %p771_p3, %p191_p4  ;;  %s206_s11 = sshll.u32 %s1137_s9, 4  ;;  %s207_s11 = int_to_ptr.vmem [resolvable:$true] %s206_s11 }
  0x26   : > { %s777_s12 = sshll.u32 %s1218_s28, 1  ;;  %s796_s18 = sshll.u32 %s1127_s22, 5 }
  0x27   : > { %p850_p9 = pneg %p1258_p8  ;;  %s1275_s17 = scalar_lea.hbm %s1433_s2, %s796_s18 }
  0x28   : > { %s248_s25 = scalar_lea.vmem [#allocation8], %s777_s12  ;;  %s974_s27 = scalar_lea.vmem %s207_s11, 256 }
  0x29   : > { %p1268_p10 = pnand %p850_p9, %p82_p2  ;;  %s256_s26 = sshll.u32 %s248_s25, 4  ;;  %s257_s26 = int_to_ptr.vmem [resolvable:$true] %s256_s26 }
  0x2a   : > { %p975_p12 = scmp.ne.s32.totalorder %s207_s11, %s974_s27  ;;  %p982_p1 = scmp.lt.s32.totalorder %s207_s11, %s207_s11 }
  0x2b   : > { %p965_p11 = pneg %p1268_p10  ;;  %p983_p3 = scmp.lt.s32.totalorder %s974_s27, %s974_s27 }
  0x2d   : > { %p977_p13 = pnand %p975_p12, %p965_p11  ;;  %p984_p4 = por %p983_p3, %p982_p1 }
  0x2f   : > { %p978_p0 = pneg %p977_p13 }
  0x31   : > { %p985_p9 = pnand %p984_p4, %p978_p0 }
  0x33   : > { %988 = shalt.err (!%p985_p9)
}
  0x34   : > { %s1438_s9 = smov 128   ;;  %s1439_s15 = smov 8  }
  0x35   : > { %s1445_s0 = sld [smem:[#allocation16_spill]]  ;;  %s1002_s16 = scalar_lea.vmem %s257_s26, 32 }
  0x36   : > { %p1003_p11 = scmp.ne.s32.totalorder %s257_s26, %s1002_s16  ;;  %s1140_s25 = smov [#allocation8]  }
  0x37   : > { %s1007_s27 = sshll.u32 %s1140_s25, 4  ;;  %s1008_s27 = int_to_ptr.vmem [resolvable:$false] %s1007_s27 }
  0x38   : > { %p1005_p12 = pnand %p1003_p11, %p937_p7  ;;  %s1009_s6 = scalar_lea.vmem %s1008_s27, 64 }
  0x39   : > { %p1010_p0 = scmp.lt.s32.totalorder %s257_s26, %s1008_s27  ;;  %p1011_p1 = scmp.lt.s32.totalorder %s1009_s6, %s1002_s16 }
  0x3a   : > { %p1006_p13 = pneg %p1005_p12 }
  0x3b   : > { %853 = dma.hbm_to_vmem [thread:$0]  (!%p1268_p10), %s1445_s0, 256, %s207_s11, [#allocation4], %s1438_s9, %s1438_s9, %s1439_s15  }
  0x3c   : > { %p1012_p3 = por %p1011_p1, %p1010_p0 }
  0x3e   : > { %p1013_p4 = pnand %p1012_p3, %p1006_p13 }
  0x40   : > { %1016 = shalt.err (!%p1013_p4)
}
  0x41   : > { %860 = dma.hbm_to_vmem [thread:$0]  (!%p1228_p6), %s1275_s17, 32, %s257_s26, %s1234_s13  }
  0x42   : > { %s797_s11 = sshll.u32 %s1127_s22, 12  ;;  %s1446_s14 = sshll.u32 %s1218_s28, 8 }
  0x43   : > { %s267_s12 = scalar_lea.vmem [#allocation9], %s1446_s14  ;;  %s273_s6 = scalar_lea.hbm %s1434_s3, %s797_s11 }
  0x44   : > { %s274_s18 = sshll.u32 %s267_s12, 4  ;;  %s264_s16 = scalar_lea.sflag [#allocation10], %s1218_s28  ;;  %s275_s18 = int_to_ptr.vmem [resolvable:$true] %s274_s18 }
  0x45   : > { %s1030_s27 = scalar_lea.vmem %s275_s18, 4096  ;;  %s1141_s15 = smov [#allocation9]  }
  0x46   : > { %p1031_p10 = scmp.ne.s32.totalorder %s275_s18, %s1030_s27  ;;  %s1035_s0 = sshll.u32 %s1141_s15, 4  ;;  %s1036_s0 = int_to_ptr.vmem [resolvable:$false] %s1035_s0 }
  0x47   : > { %s1037_s13 = scalar_lea.vmem %s1036_s0, 8192  ;;  %p1038_p12 = scmp.lt.s32.totalorder %s275_s18, %s1036_s0 }
  0x48   : > { %p1033_p9 = pnand %p1031_p10, %p937_p7  ;;  %p1039_p13 = scmp.lt.s32.totalorder %s1037_s13, %s1030_s27 }
  0x4a   : > { %p1034_p11 = pneg %p1033_p9  ;;  %p1040_p0 = por %p1039_p13, %p1038_p12 }
  0x4c   : > { %p1041_p1 = pnand %p1040_p0, %p1034_p11 }
  0x4e   : > { %1044 = shalt.err (!%p1041_p1)
}
  0x4f   : > { %s1447_s17 = smov 8   ;;  %s1448_s26 = smov 128  }
  0x50   : > { %863 = dma.hbm_to_vmem [thread:$0]  (!%p1228_p6), %s273_s6, 4096, %s275_s18, %s264_s16, %s1448_s26, %s1448_s26, %s1447_s17  }
  0x51   : > { %286 = sbr.rel (%p1258_p8) target bundleno = 590 (0x24e), region = 40 }
  0x56   : > { %1094 = dma.done.wait (%p82_p2), [#allocation4], 256  }
  0x57   : > { %1096 = vsyncadd (%p82_p2), [#allocation4], 4294967040  ;;  %s292_s0 = sand.u32 1, %s1245_s29   ;;  %s294_s28 = sand.u32 1, %s1115_s19  }
  0x58   : > { %s785_s9 = sshll.u32 %s294_s28, 8  ;;  %s293_s10 = scalar_lea.sflag [#allocation7], %s292_s0 }
  0x59   : > { %s1317_s15 = scalar_lea.vmem [#allocation6], %s785_s9 }
  0x5a   : > { %1098 = dma.done.wait (%p1254_p5), %s293_s10, 4128  }
  0x5b   : > { %1100 = vsyncadd (%p1254_p5), %s293_s10, 4294963168  ;;  %s786_s8 = sshll.u32 %s294_s28, 1  ;;  %s311_s14 = scalar_lea.sflag [#allocation10], %s294_s28 }
  0x5c   : > { %s1323_s11 = scalar_lea.vmem [#allocation8], %s786_s8  ;;  %s1325_s12 = scalar_lea.vmem [#allocation9], %s785_s9 }
  0x5d   : > { %1102 = dma.done.wait (%p1254_p5), %s311_s14, 4096  }
  0x5e   : > { %1104 = vsyncadd (%p1254_p5), %s311_s14, 4294963200  ;;  %p788_p6 = scmp.ne.s32.totalorder %s1123_s21, 0 }
  0x60   : > { %354 = sbr.rel (%p788_p6) target bundleno = 103 (0x67), region = 60 }
  0x65   : > { %v789_v0 = vld [vmem:[%s1435_s4] ss:$0 sm:$0xff] }
  0x66   : > { %362 = vst [vmem:[#allocation2] sm:$0xff] %v789_v0  ;;  %363 = vst [vmem:[#allocation2 + $0x8] sm:$0xff] %v789_v0 }
  0x67 PF: > { %v397_v1 = vld [vmem:[%s1317_s15 + $0xf8] sm:$0xff]  ;;  %v396_v2 = vld [vmem:[%s1317_s15 + $0xf0] sm:$0xff]  ;;  %v395_v3 = vld [vmem:[%s1317_s15 + $0xe8] sm:$0xff]  ;;  %v1142_v5 = vmov 0.0   ;;  %p790_p7 = scmp.ne.s32.totalorder %s1123_s21, 1 }
  0x68   : > { %410 = vmatprep.subr.mxu0 %v397_v1  ;;  %v394_v4 = vld [vmem:[%s1317_s15 + $0xe0] sm:$0xff]  ;;  %474 = vmatprep.mubr.f32.mxu0 %v1142_v5  ;;  %v393_v6 = vld [vmem:[%s1317_s15 + $0xd8] sm:$0xff]  ;;  %v392_v7 = vld [vmem:[%s1317_s15 + $0xd0] sm:$0xff] }
  0x69   : > { %411 = vmatpush1.msra.mxu0 %v396_v2  ;;  %v391_v8 = vld [vmem:[%s1317_s15 + $0xc8] sm:$0xff]  ;;  %v390_v9 = vld [vmem:[%s1317_s15 + $0xc0] sm:$0xff]  ;;  %v389_v10 = vld [vmem:[%s1317_s15 + $0xb8] sm:$0xff] }
  0x6a   : > { %412 = vmatprep.subr.mxu0 %v395_v3  ;;  %v388_v11 = vld [vmem:[%s1317_s15 + $0xb0] sm:$0xff]  ;;  %v387_v12 = vld [vmem:[%s1317_s15 + $0xa8] sm:$0xff]  ;;  %v386_v13 = vld [vmem:[%s1317_s15 + $0xa0] sm:$0xff] }
  0x6b   : > { %413 = vmatpush1.msra.mxu0 %v394_v4  ;;  %v385_v14 = vld [vmem:[%s1317_s15 + $0x98] sm:$0xff]  ;;  %v384_v15 = vld [vmem:[%s1317_s15 + $0x90] sm:$0xff]  ;;  %v383_v16 = vld [vmem:[%s1317_s15 + $0x88] sm:$0xff]  ;;  %v400_v4 = vlaneseq }
  0x6c   : > { %414 = vmatprep.subr.mxu0 %v393_v6  ;;  %v382_v17 = vld [vmem:[%s1317_s15 + $0x80] sm:$0xff]  ;;  %v381_v18 = vld [vmem:[%s1317_s15 + $0x78] sm:$0xff]  ;;  %v380_v19 = vld [vmem:[%s1317_s15 + $0x70] sm:$0xff] }
  0x6d   : > { %415 = vmatpush1.msra.mxu0 %v392_v7  ;;  %v379_v20 = vld [vmem:[%s1317_s15 + $0x68] sm:$0xff]  ;;  %v378_v21 = vld [vmem:[%s1317_s15 + $0x60] sm:$0xff]  ;;  %v377_v22 = vld [vmem:[%s1317_s15 + $0x58] sm:$0xff] }
  0x6e   : > { %416 = vmatprep.subr.mxu0 %v391_v8  ;;  %v376_v23 = vld [vmem:[%s1317_s15 + $0x50] sm:$0xff]  ;;  %v375_v24 = vld [vmem:[%s1317_s15 + $0x48] sm:$0xff]  ;;  %v374_v25 = vld [vmem:[%s1317_s15 + $0x40] sm:$0xff] }
  0x6f   : > { %417 = vmatpush1.msra.mxu0 %v390_v9  ;;  %v373_v26 = vld [vmem:[%s1317_s15 + $0x38] sm:$0xff]  ;;  %v372_v27 = vld [vmem:[%s1317_s15 + $0x30] sm:$0xff]  ;;  %v371_v28 = vld [vmem:[%s1317_s15 + $0x28] sm:$0xff] }
  0x70   : > { %418 = vmatprep.subr.mxu0 %v389_v10  ;;  %v370_v29 = vld [vmem:[%s1317_s15 + $0x20] sm:$0xff]  ;;  %v369_v30 = vld [vmem:[%s1317_s15 + $0x18] sm:$0xff]  ;;  %v368_v31 = vld [vmem:[%s1317_s15 + $0x10] sm:$0xff] }
  0x71   : > { %419 = vmatpush1.msra.mxu0 %v388_v11  ;;  %v367_v32 = vld [vmem:[%s1317_s15 + $0x8] sm:$0xff]  ;;  %v366_v33 = vld [vmem:[%s1317_s15] sm:$0xff]  ;;  %v364_v34 = vld [vmem:[#allocation3] sm:$0xff] }
  0x72   : > { %420 = vmatprep.subr.mxu0 %v387_v12  ;;  %v365_v35 = vld [vmem:[#allocation3 + $0x8] sm:$0xff]  ;;  %v550_v40 = vld [vmem:[%s1325_s12 + $0xe8] sm:$0xff]  ;;  %v549_v42 = vld [vmem:[%s1325_s12 + $0xe0] sm:$0xff] }
  0x73   : > { %421 = vmatpush1.msra.mxu0 %v386_v13  ;;  %v552_v36 = vld [vmem:[%s1325_s12 + $0xf8] sm:$0xff]  ;;  %v551_v38 = vld [vmem:[%s1325_s12 + $0xf0] sm:$0xff]  ;;  %v534_v41 = vld [vmem:[%s1325_s12 + $0x68] sm:$0xff] }
  0x74   : > { %422 = vmatprep.subr.mxu0 %v385_v14  ;;  %798 = vmatprep.subr.mxu1 %v552_v36  ;;  %v536_v37 = vld [vmem:[%s1325_s12 + $0x78] sm:$0xff]  ;;  %v535_v39 = vld [vmem:[%s1325_s12 + $0x70] sm:$0xff]  ;;  %v533_v43 = vld [vmem:[%s1325_s12 + $0x60] sm:$0xff] }
  0x75   : > { %423 = vmatpush1.msra.mxu0 %v384_v15  ;;  %799 = vmatpush3.msra.mxu1 %v536_v37  ;;  %v548_v44 = vld [vmem:[%s1325_s12 + $0xd8] sm:$0xff]  ;;  %v547_v46 = vld [vmem:[%s1325_s12 + $0xd0] sm:$0xff]  ;;  %v546_v48 = vld [vmem:[%s1325_s12 + $0xc8] sm:$0xff] }
  0x76   : > { %424 = vmatprep.subr.mxu0 %v383_v16  ;;  %800 = vmatprep.subr.mxu1 %v551_v38  ;;  %v532_v45 = vld [vmem:[%s1325_s12 + $0x58] sm:$0xff]  ;;  %v531_v47 = vld [vmem:[%s1325_s12 + $0x50] sm:$0xff]  ;;  %v530_v49 = vld [vmem:[%s1325_s12 + $0x48] sm:$0xff] }
  0x77   : > { %425 = vmatpush1.msra.mxu0 %v382_v17  ;;  %801 = vmatpush3.msra.mxu1 %v535_v39  ;;  %v545_v50 = vld [vmem:[%s1325_s12 + $0xc0] sm:$0xff]  ;;  %v544_v52 = vld [vmem:[%s1325_s12 + $0xb8] sm:$0xff]  ;;  %v543_v54 = vld [vmem:[%s1325_s12 + $0xb0] sm:$0xff] }
  0x78   : > { %426 = vmatprep.subr.mxu0 %v381_v18  ;;  %802 = vmatprep.subr.mxu1 %v550_v40  ;;  %v529_v51 = vld [vmem:[%s1325_s12 + $0x40] sm:$0xff]  ;;  %v528_v53 = vld [vmem:[%s1325_s12 + $0x38] sm:$0xff]  ;;  %v527_v55 = vld [vmem:[%s1325_s12 + $0x30] sm:$0xff] }
  0x79   : > { %427 = vmatpush1.msra.mxu0 %v380_v19  ;;  %803 = vmatpush3.msra.mxu1 %v534_v41  ;;  %v542_v56 = vld [vmem:[%s1325_s12 + $0xa8] sm:$0xff]  ;;  %v541_v58 = vld [vmem:[%s1325_s12 + $0xa0] sm:$0xff]  ;;  %v540_v60 = vld [vmem:[%s1325_s12 + $0x98] sm:$0xff] }
  0x7a   : > { %428 = vmatprep.subr.mxu0 %v379_v20  ;;  %804 = vmatprep.subr.mxu1 %v549_v42  ;;  %v526_v57 = vld [vmem:[%s1325_s12 + $0x28] sm:$0xff]  ;;  %v525_v59 = vld [vmem:[%s1325_s12 + $0x20] sm:$0xff]  ;;  %v524_v61 = vld [vmem:[%s1325_s12 + $0x18] sm:$0xff] }
  0x7b   : > { %429 = vmatpush1.msra.mxu0 %v378_v21  ;;  %805 = vmatpush3.msra.mxu1 %v533_v43  ;;  %v539_v62 = vld [vmem:[%s1325_s12 + $0x90] sm:$0xff]  ;;  %v538_v0 = vld [vmem:[%s1325_s12 + $0x88] sm:$0xff]  ;;  %v537_v2 = vld [vmem:[%s1325_s12 + $0x80] sm:$0xff] }
  0x7c   : > { %430 = vmatprep.subr.mxu0 %v377_v22  ;;  %806 = vmatprep.subr.mxu1 %v548_v44  ;;  %v523_v63 = vld [vmem:[%s1325_s12 + $0x10] sm:$0xff]  ;;  %v522_v1 = vld [vmem:[%s1325_s12 + $0x8] sm:$0xff]  ;;  %v521_v3 = vld [vmem:[%s1325_s12] sm:$0xff] }
  0x7d   : > { %431 = vmatpush1.msra.mxu0 %v376_v23  ;;  %807 = vmatpush3.msra.mxu1 %v532_v45  ;;  %v398_v7 = vld [vmem:[%s1323_s11] sm:$0x3] }
  0x7e   : > { %432 = vmatprep.subr.mxu0 %v375_v24  ;;  %808 = vmatprep.subr.mxu1 %v547_v46 }
  0x7f   : > { %433 = vmatpush1.msra.mxu0 %v374_v25  ;;  %809 = vmatpush3.msra.mxu1 %v531_v47 }
  0x80   : > { %434 = vmatprep.subr.mxu0 %v373_v26  ;;  %810 = vmatprep.subr.mxu1 %v546_v48 }
  0x81   : > { %435 = vmatpush1.msra.mxu0 %v372_v27  ;;  %811 = vmatpush3.msra.mxu1 %v530_v49 }
  0x82   : > { %436 = vmatprep.subr.mxu0 %v371_v28  ;;  %812 = vmatprep.subr.mxu1 %v545_v50 }
  0x83   : > { %437 = vmatpush1.msra.mxu0 %v370_v29  ;;  %813 = vmatpush3.msra.mxu1 %v529_v51 }
  0x84   : > { %438 = vmatprep.subr.mxu0 %v369_v30  ;;  %814 = vmatprep.subr.mxu1 %v544_v52  ;;  %v519_v52 = vld [vmem:[#allocation2] sm:$0xff] }
  0x85   : > { %439 = vmatpush1.msra.mxu0 %v368_v31  ;;  %815 = vmatpush3.msra.mxu1 %v528_v53 }
  0x86   : > { %440 = vmatprep.subr.mxu0 %v367_v32  ;;  %816 = vmatprep.subr.mxu1 %v543_v54 }
  0x87   : > { %441 = vmatpush1.msra.mxu0 %v366_v33  ;;  %817 = vmatpush3.msra.mxu1 %v527_v55 }
  0x88   : > { %475 = vmatmul.mubr.f32.vlgmr.msra.gmra.mxu0 %v364_v34  ;;  %818 = vmatprep.subr.mxu1 %v542_v56 }
  0x89   : > { %480 = vmatprep.mubr.f32.mxu0 %v1142_v5  ;;  %819 = vmatpush3.msra.mxu1 %v526_v57  ;;  %v401_v5 = vshrl.u32 %v400_v4, 7  ;;  %v520_v57 = vld [vmem:[#allocation2 + $0x8] sm:$0xff] }
  0x8a   : > { %820 = vmatprep.subr.mxu1 %v541_v58 }
  0x8b   : > { %821 = vmatpush3.msra.mxu1 %v525_v59  ;;  %v402_v6 = vsub.s32 0, %v401_v5  ;;  %v406_v8 = vsub.s32 1, %v401_v5 }
  0x8c   : > { %481 = vmatmul.mubr.f32.gmra.mxu0 %v365_v35  ;;  %822 = vmatprep.subr.mxu1 %v540_v60 }
  0x8d   : > { %823 = vmatpush3.msra.mxu1 %v524_v61  ;;  %v403_v9 = vrot.slane %v398_v7, %v402_v6  ;;  %v407_v10 = vrot.slane %v398_v7, %v406_v8 }
  0x8e   : > { %824 = vmatprep.subr.mxu1 %v539_v62 }
  0x8f   : > { %825 = vmatpush3.msra.mxu1 %v523_v63 }
  0x90   : > { %826 = vmatprep.subr.mxu1 %v538_v0 }
  0x91   : > { %827 = vmatpush3.msra.mxu1 %v522_v1 }
  0x92   : > { %828 = vmatprep.subr.mxu1 %v537_v2 }
  0x93   : > { %829 = vmatpush3.msra.mxu1 %v521_v3 }
 0x148   : > { %v476_v11 = vpop.f32.mrf.mxu0 }
 0x149   : > { %v477_v12 = vadd.f32 %v476_v11, %v403_v9 }
 0x14a   : > { %v478_v13 = vpop.f32.mrf.mxu0 }
 0x14b   : > { %v487_v14 = vmul.f32 %v477_v12, %v477_v12  ;;  %v479_v15 = vadd.f32 %v478_v13, %v407_v10 }
 0x14c   : > { %v482_v16 = vpop.f32.mrf.mxu0 }
 0x14d   : > { %v491_v17 = vmul.f32 0.035677407, %v487_v14  ;;  %v488_v18 = vmul.f32 %v479_v15, %v479_v15  ;;  %v483_v19 = vadd.f32 %v482_v16, %v403_v9 }
 0x14e   : > { %v484_v20 = vpop.f32.mrf.mxu0 }
 0x14f   : > { %v495_v21 = vadd.f32 0.7978846, %v491_v17  ;;  %v492_v22 = vmul.f32 0.035677407, %v488_v18  ;;  %v489_v23 = vmul.f32 %v483_v19, %v483_v19  ;;  %v485_v24 = vadd.f32 %v484_v20, %v407_v10 }
 0x151   : > { %v499_v25 = vmul.f32 %v495_v21, %v477_v12  ;;  %v496_v26 = vadd.f32 0.7978846, %v492_v22  ;;  %v493_v27 = vmul.f32 0.035677407, %v489_v23  ;;  %v490_v28 = vmul.f32 %v485_v24, %v485_v24 }
 0x153   : > { %927 = vtanh.f32 %v499_v25  ;;  %v500_v29 = vmul.f32 %v496_v26, %v479_v15  ;;  %v497_v30 = vadd.f32 0.7978846, %v493_v27  ;;  %v494_v31 = vmul.f32 0.035677407, %v490_v28 }
 0x155   : > { %929 = vtanh.f32 %v500_v29  ;;  %v501_v32 = vmul.f32 %v497_v30, %v483_v19  ;;  %v498_v33 = vadd.f32 0.7978846, %v494_v31 }
 0x157   : > { %931 = vtanh.f32 %v501_v32  ;;  %v502_v34 = vmul.f32 %v498_v33, %v485_v24 }
 0x159   : > { %933 = vtanh.f32 %v502_v34 }
 0x160   : > { %v928_v35 = vpop.eup %927 }
 0x161   : > { %v507_v36 = vmul.f32 0.5, %v928_v35 }
 0x162   : > { %v930_v37 = vpop.eup %929 }
 0x163   : > { %v508_v38 = vmul.f32 0.5, %v930_v37  ;;  %v511_v40 = vadd.f32 0.5, %v507_v36 }
 0x164   : > { %v932_v39 = vpop.eup %931 }
 0x165   : > { %v512_v41 = vadd.f32 0.5, %v508_v38  ;;  %v509_v42 = vmul.f32 0.5, %v932_v39  ;;  %v515_v46 = vmul.f32 %v511_v40, %v477_v12 }
 0x166   : > { %v934_v43 = vpop.eup %933 }
 0x167   : > { %v516_v44 = vmul.f32 %v512_v41, %v479_v15  ;;  %v510_v45 = vmul.f32 0.5, %v934_v43  ;;  %v513_v47 = vadd.f32 0.5, %v509_v42 }
 0x169   : > { %617 = vmatprep.mubr.f32.mxu1 %v516_v44  ;;  %v514_v48 = vadd.f32 0.5, %v510_v45  ;;  %v517_v50 = vmul.f32 %v513_v47, %v483_v19 }
 0x16a   : > { %618 = vmatmul.mubr.f32.vlgmr.msra.gmra.mxu1 %v515_v46 }
 0x16b   : > { %v518_v49 = vmul.f32 %v514_v48, %v485_v24 }
 0x16d   : > { %622 = vmatprep.mubr.f32.mxu1 %v518_v49 }
 0x16e   : > { %623 = vmatmul.mubr.f32.gmra.mxu1 %v517_v50 }
 0x22a   : > { %v830_v51 = vpop.f32.mrf.mxu1 }
 0x22c   : > { %v831_v53 = vpop.f32.mrf.mxu1 }
 0x22d   : > { %v832_v54 = vadd.f32 %v831_v53, %v830_v51 }
 0x22e   : > { %v833_v55 = vpop.f32.mrf.mxu1 }
 0x22f   : > { %v628_v56 = vadd.f32 %v832_v54, %v519_v52 }
 0x230   : > { %v834_v58 = vpop.f32.mrf.mxu1 }
 0x231   : > { %630 = vst [vmem:[#allocation2] sm:$0xff] %v628_v56  ;;  %v835_v59 = vadd.f32 %v834_v58, %v833_v55  ;;  %635 = sbr.rel (%p790_p7) target bundleno = 574 (0x23e), region = 64 }
 0x233   : > { %v629_v60 = vadd.f32 %v835_v59, %v520_v57 }
 0x235   : > { %631 = vst [vmem:[#allocation2 + $0x8] sm:$0xff] %v629_v60 }
 0x238   : > { %v636_v61 = vld [vmem:[#allocation2] sm:$0xff] }
 0x239   : > { %638 = vst [vmem:[#allocation11] sm:$0xff] %v636_v61 }
 0x23c   : > { %v637_v62 = vld [vmem:[#allocation2 + $0x8] sm:$0xff] }
 0x23d   : > { %639 = vst [vmem:[#allocation11 + $0x8] sm:$0xff] %v637_v62 }
 0x23e PF: > { %p867_p2 = scmp.eq.s32.totalorder %s1245_s29, 1  ;;  %s1143_s7 = smov [#allocation11]  }
 0x23f   : > { %s649_s6 = sshll.u32 %s1143_s7, 4  ;;  %s650_s6 = int_to_ptr.vmem [resolvable:$true] %s649_s6 }
 0x240   : > { %s1045_s16 = scalar_lea.vmem %s650_s6, 256  ;;  %p1052_p4 = scmp.lt.s32.totalorder %s650_s6, %s650_s6 }
 0x241   : > { %p1046_p5 = scmp.ne.s32.totalorder %s650_s6, %s1045_s16  ;;  %p1053_p10 = scmp.lt.s32.totalorder %s1045_s16, %s1045_s16 }
 0x243   : > { %p1047_p8 = pnand %p1046_p5, %p867_p2  ;;  %p1054_p9 = por %p1053_p10, %p1052_p4 }
 0x245   : > { %p1048_p3 = pneg %p1047_p8 }
 0x247   : > { %p1055_p11 = pnand %p1054_p9, %p1048_p3 }
 0x249   : > { %1058 = shalt.err (!%p1055_p11)
}
 0x24a   : > { %s1144_s21 = smov 128   ;;  %s1145_s27 = smov 8  }
 0x24b   : > { %847 = dma.vmem_to_hbm [thread:$0]  (%p867_p2), %s650_s6, 256, %s1436_s5, [#allocation5], %s1144_s21, %s1144_s21, %s1145_s27  }
 0x24c   : > { %1106 = dma.done.wait (%p867_p2), [#allocation5], 256  }
 0x24d   : > { %1108 = vsyncadd (%p867_p2), [#allocation5], 4294967040 }
 0x24e PF: > { %s23_s23 = sadd.s32 1, %s1131_s23   ;;  %s1449_s18 = smov %s1115_s19 }
 0x24f   : > { %p20_p12 = scmp.ge.s32.totalorder %s23_s23, 4   ;;  %s1450_s19 = smov %s1119_s20 }
 0x250   : > { %s1451_s20 = smov %s1222_s30  ;;  %s1452_s21 = smov %s1127_s22 }
 0x251   : > { %s1453_s22 = smov %s1455_s24  ;;  %22 = sbr.rel (!%p20_p12) target bundleno = 10 (0xa), region = 116 }
 0x256   :  { %665 = vsyncpa [#allocation4], 1 }
 0x257   :  { %667 = vsyncpa [#allocation4 + $0x1], 1 }
 0x258   :  { %668 = vsyncpa [#allocation7], 1 }
 0x259   :  { %670 = vsyncpa [#allocation7 + $0x1], 1 }
 0x25a   :  { %671 = vsyncpa [#allocation10], 1 }
 0x25b   :  { %673 = vsyncpa [#allocation10 + $0x1], 1 }
 0x25c   :  { %674 = vsyncpa [#allocation5], 1 }
 0x25d   :  { %676 = vsyncpa [#allocation5 + $0x1], 1 }

</bundles_post_ra>
